<compile_context>
chip_gen: v7x
topology: tpu7x:2x2x1
jax: 0.10.0
libtpu: 0.0.40
codegen_flags: <defaults>
</compile_context>

<pallas_src>
import jax
import jax.numpy as jnp
from jax.experimental import pallas as pl
from jax.experimental.pallas import tpu as pltpu


def _linear_kernel(x_ref, w_ref, b_ref, o_ref):
    # x_ref: (TM, D) VMEM tile   w_ref: (1, D) VMEM resident
    # b_ref: (1, 1) SMEM scalar  o_ref: (1, TM) lane-dense output slab
    x = x_ref[...]
    w = w_ref[...]
    b = b_ref[0, 0]
    # VPU multiply + XLU cross-lane reduce (out_features == 1, so no MXU).
    y = jnp.sum(x * w, axis=-1) + b                  # (TM,)
    o_ref[...] = y[None, :].astype(o_ref.dtype)      # present lane-dense row


def linear_regression_forward(x, weight, bias, *, block_rows=512):
    """x: (N, D) f32, weight: (1, D) f32, bias: (1,) f32 -> (N, 1) f32."""
    n, d = x.shape
    out_f, d_w = weight.shape
    assert d == d_w and out_f == 1

    # --- pick the batch tile TM -------------------------------------------
    # Lane-dense output wants TM to be a multiple of 128; cap the x tile at
    # ~4 MiB so 2x double-buffering fits inside the default scoped-VMEM budget
    # on every generation (16 MiB v5e / 32 MiB v6e / 32 MiB-of-64 v7x).
    tile_budget_bytes = 4 * 1024 * 1024
    rows_by_vmem = max(128, (tile_budget_bytes // (max(d, 1) * 4)) // 128 * 128)
    tm = max(128, (min(block_rows, rows_by_vmem) // 128) * 128)
    tm = min(tm, pl.cdiv(n, 128) * 128)              # don't over-pad tiny batches

    n_pad = pl.cdiv(n, tm) * tm
    if n_pad != n:
        x = jnp.pad(x, ((0, n_pad - n), (0, 0)))
    num_tiles = n_pad // tm

    bias2d = bias.reshape(1, 1)

    cost = pl.CostEstimate(
        flops=2 * n_pad * d,
        transcendentals=0,
        bytes_accessed=n_pad * d * 4 + n_pad * 4 + d * 4,
    )

    out_row = pl.pallas_call(
        _linear_kernel,
        out_shape=jax.ShapeDtypeStruct((1, n_pad), jnp.float32),
        grid_spec=pltpu.PrefetchScalarGridSpec(
            num_scalar_prefetch=0,
            grid=(num_tiles,),
            in_specs=[
                # x: pipelined (double-buffered) batch tiles.
                pl.BlockSpec((tm, d), lambda i: (i, 0)),
                # weight: whole-array resident in VMEM (tiny, never changes).
                pl.BlockSpec(memory_space=pltpu.MemorySpace.VMEM),
                # bias: scalar in SMEM.
                pl.BlockSpec(memory_space=pltpu.MemorySpace.SMEM),
            ],
            # lane-dense (1, TM) output slabs -> unmasked full-lane stores.
            out_specs=pl.BlockSpec((1, tm), lambda i: (0, i)),
        ),
        compiler_params=pltpu.CompilerParams(
            dimension_semantics=("parallel",),   # megacore sharding on v7x
        ),
        cost_estimate=cost,
    )(x, weight, bias2d)

    # Cheap wrapper-side layout plumbing back to the module's (N, 1) shape.
    return out_row[0, :n].reshape(n, 1)


if __name__ == "__main__":
    input_dim = 1  # implied by the reference x = [[1],[2],[3],[4]]

    # Deterministic PyTorch-nn.Linear-style init: U(-1/sqrt(D), 1/sqrt(D)).
    key = jax.random.PRNGKey(0)
    k_w, k_b, k_x = jax.random.split(key, 3)
    bound = 1.0 / (input_dim ** 0.5)
    weight = jax.random.uniform(
        k_w, (1, input_dim), dtype=jnp.float32, minval=-bound, maxval=bound
    )
    bias = jax.random.uniform(
        k_b, (1,), dtype=jnp.float32, minval=-bound, maxval=bound
    )

    # Example input from the reference script (batch=4, features=1).
    x = jnp.array([[1.0], [2.0], [3.0], [4.0]], dtype=jnp.float32)
    y = linear_regression_forward(x, weight, bias)
    jax.block_until_ready(y)
    y_ref = x @ weight.T + bias
    assert y.shape == (4, 1)
    assert jnp.allclose(y, y_ref, atol=1e-5, rtol=1e-5)

    # Second check: ragged batch + multi-tile grid path (N not divisible by TM).
    d2 = 8
    w2 = jax.random.uniform(k_w, (1, d2), dtype=jnp.float32, minval=-1.0, maxval=1.0)
    b2 = jax.random.uniform(k_b, (1,), dtype=jnp.float32, minval=-1.0, maxval=1.0)
    x2 = jax.random.normal(k_x, (300, d2), dtype=jnp.float32)
    y2 = linear_regression_forward(x2, w2, b2, block_rows=128)
    jax.block_until_ready(y2)
    y2_ref = x2 @ w2.T + b2
    assert y2.shape == (300, 1)
    assert jnp.allclose(y2, y2_ref, atol=1e-4, rtol=1e-4)

    print("KERNEL_OK")
</pallas_src>

<mosaic_0001>
module attributes {stable_mosaic.version = 11 : i64} {
  func.func @_linear_kernel(%arg0: i32, %arg1: memref<128x1xf32, #tpu.memory_space<vmem>>, %arg2: memref<1x1xf32, #tpu.memory_space<vmem>>, %arg3: memref<1x1xf32, #tpu.memory_space<smem>>, %arg4: memref<1x128xf32, #tpu.memory_space<vmem>>) attributes {dimension_semantics = [#tpu.dimension_semantics<parallel>], iteration_bounds = array<i64: 1>, scalar_prefetch = 0 : i64, scratch_operands = 0 : i64, tpu.core_type = #tpu.core_type<tc>, window_params = [{transform_indices = @transform_0, window_bounds = array<i64: 128, 1>}, {pipeline_mode = #tpu.pipeline_mode<synchronous>, transform_indices = @transform_1, window_bounds = array<i64: 1, 1>}, {transform_indices = @transform_2, window_bounds = array<i64: 1, 1>}, {transform_indices = @transform_3, window_bounds = array<i64: 1, 128>}]} {
    %c0 = arith.constant 0 : index
    %c0_0 = arith.constant 0 : index
    %0 = vector.load %arg1[%c0, %c0_0] : memref<128x1xf32, #tpu.memory_space<vmem>>, vector<128x1xf32>
    %c0_1 = arith.constant 0 : index
    %c0_2 = arith.constant 0 : index
    %1 = vector.load %arg2[%c0_1, %c0_2] : memref<1x1xf32, #tpu.memory_space<vmem>>, vector<1x1xf32>
    %c0_3 = arith.constant 0 : index
    %c0_4 = arith.constant 0 : index
    %2 = memref.load %arg3[%c0_3, %c0_4] : memref<1x1xf32, #tpu.memory_space<smem>>
    %3 = vector.broadcast %1 : vector<1x1xf32> to vector<128x1xf32>
    %4 = arith.mulf %0, %3 : vector<128x1xf32>
    %cst = arith.constant dense<0.000000e+00> : vector<128xf32>
    %5 = vector.multi_reduction <add>, %4, %cst [1] : vector<128x1xf32> to vector<128xf32>
    %6 = vector.broadcast %2 : f32 to vector<128xf32>
    %7 = arith.addf %5, %6 : vector<128xf32>
    %8 = vector.shape_cast %7 : vector<128xf32> to vector<1x128xf32>
    %c0_5 = arith.constant 0 : index
    %c0_6 = arith.constant 0 : index
    %9 = vector.load %arg4[%c0_5, %c0_6] : memref<1x128xf32, #tpu.memory_space<vmem>>, vector<1x128xf32>
    tpu.vector_store %arg4[%c0_5, %c0_6], %8 {strides = array<i32>} : memref<1x128xf32, #tpu.memory_space<vmem>>, vector<1x128xf32>,
    return
  }
  func.func @transform_0(%arg0: i32) -> (i32, i32) {
    %c0_i32 = arith.constant 0 : i32
    %c0_i32_0 = arith.constant 0 : i32
    return %arg0, %c0_i32 : i32, i32
  }
  func.func @transform_1(%arg0: i32) -> (i32, i32) {
    %c0_i32 = arith.constant 0 : i32
    %c0_i32_0 = arith.constant 0 : i32
    %c0_i32_1 = arith.constant 0 : i32
    return %c0_i32, %c0_i32_0 : i32, i32
  }
  func.func @transform_2(%arg0: i32) -> (i32, i32) {
    %c0_i32 = arith.constant 0 : i32
    %c0_i32_0 = arith.constant 0 : i32
    %c0_i32_1 = arith.constant 0 : i32
    return %c0_i32, %c0_i32_0 : i32, i32
  }
  func.func @transform_3(%arg0: i32) -> (i32, i32) {
    %c0_i32 = arith.constant 0 : i32
    %c0_i32_0 = arith.constant 0 : i32
    return %c0_i32, %arg0 : i32, i32
  }
}

</mosaic_0001>

<bundles_post_ra>
// kernel: tpu_custom_call.1
= control target key start
LH: loop header
LB: loop body
LE: loop exit
PB: predicated region body
PF: predicated region fallthrough
CT: control target
= control target key end

     0   :  { %s453_s0 = inlined_call_operand.vmem [shape: f32[128,1], index: 0, kind: input, shape index: {}]   ;;  %s454_s1 = inlined_call_operand.<no memory space> [shape: f32[1,1], index: 1, kind: input, shape index: {}]   ;;  %s455_s2 = inlined_call_operand.<no memory space> [shape: f32[1,1], index: 2, kind: input, shape index: {}]   ;;  %s456_s3 = inlined_call_operand.hbm [shape: f32[1,128], index: 3, kind: output, shape index: {}]  }
   0x1   :  { %v8_v0 = vstv %s454_s1 }
   0x2   :  { %9 = vst [vmem:[#allocation2] sm:$0x1] %v8_v0 }
   0x3   :  { %v20_v1 = vld [vmem:[%s453_s0 + $0x10] sm:$0xff]  ;;  %v342_v3 = vstv %s455_s2  ;;  %v18_v4 = vld [vmem:[%s453_s0] sm:$0xff]  ;;  %v311_v5 = vmov 0   ;;  %v21_v8 = vld [vmem:[%s453_s0 + $0x18] sm:$0xff] }
   0x4   :  { %286 = vset.pattern.permute.xlu1 %v311_v5  ;;  %285 = vset.pattern.permute.xlu0 %v311_v5  ;;  %v19_v9 = vld [vmem:[%s453_s0 + $0x8] sm:$0xff]  ;;  %v22_v13 = vld [vmem:[%s453_s0 + $0x20] sm:$0xff]  ;;  %v25_v20 = vld [vmem:[%s453_s0 + $0x38] sm:$0xff] }
   0x5   :  { %v23_v10 = vld [vmem:[%s453_s0 + $0x28] sm:$0xff] }
   0x9   :  { %v282_v2 = vld [vmem:[#allocation2] ss:$0 sm:$0xff] }
   0xa   :  { %v44_v6 = vmul.f32 %v282_v2, %v20_v1  ;;  %v42_v7 = vmul.f32 %v282_v2, %v18_v4  ;;  %v45_v11 = vmul.f32 %v282_v2, %v21_v8  ;;  %v43_v12 = vmul.f32 %v282_v2, %v19_v9 }
   0xb   :  { %v47_v16 = vmul.f32 %v282_v2, %v23_v10  ;;  %v46_v19 = vmul.f32 %v282_v2, %v22_v13 }
   0xc   :  { %v77_v14 = vadd.f32 %v342_v3, %v44_v6  ;;  %v75_v15 = vadd.f32 %v342_v3, %v42_v7  ;;  %v78_v17 = vadd.f32 %v342_v3, %v45_v11  ;;  %v76_v18 = vadd.f32 %v342_v3, %v43_v12 }
   0xe   :  { %114 = vperm.xlu1 %286, %v77_v14   ;;  %108 = vperm.xlu0 %285, %v75_v15  }
   0xf   :  { %11 = vsyncpa [#allocation5], 0  ;;  %v24_v21 = vld [vmem:[%s453_s0 + $0x30] sm:$0xff]  ;;  %v49_v22 = vmul.f32 %v282_v2, %v25_v20  ;;  %v80_v23 = vadd.f32 %v342_v3, %v47_v16  ;;  %v79_v24 = vadd.f32 %v342_v3, %v46_v19  ;;  %v27_v26 = vld [vmem:[%s453_s0 + $0x48] sm:$0xff]  ;;  %v155_v52 = vlaneseq }
  0x10   :  { %v48_v25 = vmul.f32 %v282_v2, %v24_v21  ;;  %v26_v27 = vld [vmem:[%s453_s0 + $0x40] sm:$0xff]  ;;  %v51_v30 = vmul.f32 %v282_v2, %v27_v26  ;;  %v29_v32 = vld [vmem:[%s453_s0 + $0x58] sm:$0xff]  ;;  %v28_v33 = vld [vmem:[%s453_s0 + $0x50] sm:$0xff]  ;;  %vm166_vm0 = vcmask 130112   ;;  %vm173_vm1 = vcmask 195712  }
  0x11   :  { %v82_v28 = vadd.f32 %v342_v3, %v49_v22  ;;  %v50_v31 = vmul.f32 %v282_v2, %v26_v27  ;;  %v53_v34 = vmul.f32 %v282_v2, %v29_v32  ;;  %v52_v37 = vmul.f32 %v282_v2, %v28_v33  ;;  %v31_v38 = vld [vmem:[%s453_s0 + $0x68] sm:$0xff]  ;;  %v30_v39 = vld [vmem:[%s453_s0 + $0x60] sm:$0xff]  ;;  %v33_v44 = vld [vmem:[%s453_s0 + $0x78] sm:$0xff] }
  0x12   :  { %117 = vperm.xlu1 %286, %v78_v17   ;;  %111 = vperm.xlu0 %285, %v76_v18   ;;  %v81_v29 = vadd.f32 %v342_v3, %v48_v25  ;;  %v84_v35 = vadd.f32 %v342_v3, %v51_v30  ;;  %v55_v40 = vmul.f32 %v282_v2, %v31_v38  ;;  %v32_v45 = vld [vmem:[%s453_s0 + $0x70] sm:$0xff]  ;;  %v405_v53 = vand.u32 127, %v155_v52  ;;  %s312_s0 = smov [#allocation4]  }
  0x13   :  { %v83_v36 = vadd.f32 %v342_v3, %v50_v31  ;;  %v86_v41 = vadd.f32 %v342_v3, %v53_v34  ;;  %v85_v42 = vadd.f32 %v342_v3, %v52_v37  ;;  %v54_v43 = vmul.f32 %v282_v2, %v30_v39  ;;  %s274_s19 = sshll.u32 %s312_s0, 4  ;;  %s275_s19 = int_to_ptr.vmem [resolvable:$true] %s274_s19 }
  0x14   :  { %v57_v46 = vmul.f32 %v282_v2, %v33_v44  ;;  %v88_v47 = vadd.f32 %v342_v3, %v55_v40  ;;  %v56_v49 = vmul.f32 %v282_v2, %v32_v45  ;;  %v407_v54 = vshrl.u32 %v155_v52, 7  ;;  %s287_s1 = scalar_lea.vmem %s275_s19, 16  ;;  %s291_s20 = scalar_lea.vmem %s275_s19, 32 }
  0x15   :  { %v87_v48 = vadd.f32 %v342_v3, %v54_v43  ;;  %v161_v55 = vadd.s32 4294967288, %v405_v53  ;;  %v168_v56 = vadd.s32 4294967280, %v405_v53  ;;  %v175_v57 = vadd.s32 4294967272, %v405_v53  ;;  %p288_p0 = scmp.ne.s32.totalorder %s275_s19, %s287_s1  ;;  %p292_p1 = scmp.lt.s32.totalorder %s275_s19, %s275_s19 }
  0x16   :  { %123 = vperm.xlu1 %286, %v80_v23   ;;  %120 = vperm.xlu0 %285, %v79_v24   ;;  %v90_v50 = vadd.f32 %v342_v3, %v57_v46  ;;  %v89_v51 = vadd.f32 %v342_v3, %v56_v49  ;;  %v159_v60 = vsub.s32 %v405_v53, %v407_v54  ;;  %v182_v62 = vadd.s32 4294967264, %v405_v53  ;;  %p293_p2 = scmp.lt.s32.totalorder %s291_s20, %s287_s1 }
  0x17   :  { %v164_v61 = vsub.s32 %v161_v55, %v407_v54  ;;  %v171_v63 = vsub.s32 %v168_v56, %v407_v54  ;;  %v189_v0 = vadd.s32 4294967256, %v405_v53  ;;  %v178_v1 = vsub.s32 %v175_v57, %v407_v54 }
  0x18   :  { %v185_v6 = vsub.s32 %v182_v62, %v407_v54  ;;  %v196_v7 = vadd.s32 4294967248, %v405_v53  ;;  %vm180_vm2 = vcmask 261312   ;;  %v203_v10 = vadd.s32 4294967240, %v405_v53  ;;  %p294_p3 = por %p293_p2, %p292_p1 }
  0x19   :  { %v192_v9 = vsub.s32 %v189_v0, %v407_v54  ;;  %vm187_vm3 = vcmask 326912   ;;  %v210_v19 = vadd.s32 4294967232, %v405_v53  ;;  %v217_v22 = vadd.s32 4294967224, %v405_v53 }
  0x1a   :  { %129 = vperm.xlu1 %286, %v82_v28   ;;  %126 = vperm.xlu0 %285, %v81_v29   ;;  %v199_v18 = vsub.s32 %v196_v7, %v407_v54  ;;  %v206_v21 = vsub.s32 %v203_v10, %v407_v54  ;;  %vm194_vm4 = vcmask 392512   ;;  %vm201_vm5 = vcmask 458112   ;;  %p295_p4 = pnand %p294_p3, %p288_p0 }
  0x1b   :  { %v213_v27 = vsub.s32 %v210_v19, %v407_v54  ;;  %v224_v28 = vadd.s32 4294967216, %v405_v53  ;;  %v220_v31 = vsub.s32 %v217_v22, %v407_v54  ;;  %v231_v32 = vadd.s32 4294967208, %v405_v53 }
  0x1c   :  { %vm208_vm6 = vcmask 523712   ;;  %vm215_vm7 = vcmask 589312   ;;  %v238_v38 = vadd.s32 4294967200, %v405_v53  ;;  %vm222_vm8 = vcmask 654912  }
  0x1d   :  { %v227_v37 = vsub.s32 %v224_v28, %v407_v54  ;;  %vm229_vm9 = vcmask 720512   ;;  %v252_v49 = vadd.s32 4294967184, %v405_v53  ;;  %vm236_vm10 = vcmask 786112  }
  0x1e   :  { %135 = vperm.xlu1 %286, %v84_v35   ;;  %132 = vperm.xlu0 %285, %v83_v36   ;;  %vm243_vm11 = vcmask 851712   ;;  %vm250_vm12 = vcmask 917312   ;;  %vm257_vm13 = vcmask 982912   ;;  %vm264_vm14 = vcmask 1048512  }
  0x22   :  { %141 = vperm.xlu1 %286, %v86_v41   ;;  %138 = vperm.xlu0 %285, %v85_v42   ;;  %v234_v41 = vsub.s32 %v231_v32, %v407_v54  ;;  %v245_v42 = vadd.s32 4294967192, %v405_v53 }
  0x24   :  { %v248_v52 = vsub.s32 %v245_v42, %v407_v54 }
  0x26   :  { %147 = vperm.xlu1 %286, %v88_v47   ;;  %144 = vperm.xlu0 %285, %v87_v48   ;;  %v241_v47 = vsub.s32 %v238_v38, %v407_v54  ;;  %v259_v48 = vadd.s32 4294967176, %v405_v53 }
  0x2a   :  { %153 = vperm.xlu1 %286, %v90_v50   ;;  %150 = vperm.xlu0 %285, %v89_v51  }
  0x8d   :  { %v115_v58 = vpop.permute.xlu1 %114  ;;  %v109_v59 = vpop.permute.xlu0 %108 }
  0x8e   :  { %v160_v4 = vrot.slane %v109_v59, %v159_v60  ;;  %v172_v8 = vrot.slane %v115_v58, %v171_v63  ;;  %v262_v59 = vsub.s32 %v259_v48, %v407_v54  ;;  %v255_v60 = vsub.s32 %v252_v49, %v407_v54 }
  0x91   :  { %v118_v2 = vpop.permute.xlu1 %117  ;;  %v112_v3 = vpop.permute.xlu0 %111 }
  0x92   :  { %v165_v5 = vrot.slane %v112_v3, %v164_v61  ;;  %v179_v11 = vrot.slane %v118_v2, %v178_v1 }
  0x94   :  { %v167_v12 = vsel %vm166_vm0, %v165_v5, %v160_v4 }
  0x95   :  { %v174_v13 = vsel %vm173_vm1, %v172_v8, %v167_v12  ;;  %v124_v14 = vpop.permute.xlu1 %123  ;;  %v121_v15 = vpop.permute.xlu0 %120 }
  0x96   :  { %v181_v16 = vsel %vm180_vm2, %v179_v11, %v174_v13  ;;  %v186_v17 = vrot.slane %v121_v15, %v185_v6  ;;  %v193_v20 = vrot.slane %v124_v14, %v192_v9 }
  0x98   :  { %v188_v23 = vsel %vm187_vm3, %v186_v17, %v181_v16 }
  0x99   :  { %v130_v24 = vpop.permute.xlu1 %129  ;;  %v127_v25 = vpop.permute.xlu0 %126  ;;  %v195_v30 = vsel %vm194_vm4, %v193_v20, %v188_v23 }
  0x9a   :  { %v200_v26 = vrot.slane %v127_v25, %v199_v18  ;;  %v207_v29 = vrot.slane %v130_v24, %v206_v21 }
  0x9c   :  { %v202_v33 = vsel %vm201_vm5, %v200_v26, %v195_v30 }
  0x9d   :  { %v136_v34 = vpop.permute.xlu1 %135  ;;  %v133_v35 = vpop.permute.xlu0 %132  ;;  %v209_v40 = vsel %vm208_vm6, %v207_v29, %v202_v33 }
  0x9e   :  { %v214_v36 = vrot.slane %v133_v35, %v213_v27  ;;  %v221_v39 = vrot.slane %v136_v34, %v220_v31 }
  0xa0   :  { %v216_v43 = vsel %vm215_vm7, %v214_v36, %v209_v40 }
  0xa1   :  { %v142_v44 = vpop.permute.xlu1 %141  ;;  %v139_v45 = vpop.permute.xlu0 %138  ;;  %v223_v51 = vsel %vm222_vm8, %v221_v39, %v216_v43 }
  0xa2   :  { %v228_v46 = vrot.slane %v139_v45, %v227_v37  ;;  %v235_v50 = vrot.slane %v142_v44, %v234_v41 }
  0xa4   :  { %v230_v55 = vsel %vm229_vm9, %v228_v46, %v223_v51 }
  0xa5   :  { %v148_v56 = vpop.permute.xlu1 %147  ;;  %v145_v57 = vpop.permute.xlu0 %144  ;;  %v237_v62 = vsel %vm236_vm10, %v235_v50, %v230_v55 }
  0xa6   :  { %v242_v58 = vrot.slane %v145_v57, %v241_v47  ;;  %v249_v61 = vrot.slane %v148_v56, %v248_v52 }
  0xa8   :  { %v244_v63 = vsel %vm243_vm11, %v242_v58, %v237_v62 }
  0xa9   :  { %v154_v0 = vpop.permute.xlu1 %153  ;;  %v151_v53 = vpop.permute.xlu0 %150  ;;  %v251_v3 = vsel %vm250_vm12, %v249_v61, %v244_v63 }
  0xaa   :  { %v263_v1 = vrot.slane %v154_v0, %v262_v59  ;;  %v256_v2 = vrot.slane %v151_v53, %v255_v60 }
  0xac   :  { %v258_v4 = vsel %vm257_vm13, %v256_v2, %v251_v3 }
  0xad   :  { %v265_v5 = vsel %vm264_vm14, %v263_v1, %v258_v4 }
  0xae   :  { %267 = vst [vmem:[#allocation4] sm:$0x1] %v265_v5 }
  0xaf   :  { %298 = shalt.err (!%p295_p4)
}
  0xb0   :  { %s299_s23 = scalar_lea.hbm %s456_s3, 16 }
  0xb1   :  { %p300_p5 = scmp.ne.s32.totalorder %s456_s3, %s299_s23  ;;  %p303_p6 = scmp.lt.u32.totalorder %s299_s23, %s456_s3 }
  0xb3   :  { %p305_p7 = pnand %p303_p6, %p300_p5 }
  0xb5   :  { %308 = shalt.err (!%p305_p7)
}
  0xb6   :  { %277 = dma.vmem_to_hbm [thread:$0]  %s275_s19, 16, %s456_s3, [#allocation5]  }
  0xb7   :  { %309 = dma.done.wait [#allocation5], 16  }
  0xb8   :  { %310 = vsyncadd [#allocation5], 4294967280 }
  0xb9   :  { %281 = vsyncpa [#allocation5], 1 }

</bundles_post_ra>
